<compile_context>
chip_gen: v7x
topology: tpu7x:2x2x1
jax: 0.10.0
libtpu: 0.0.40
codegen_flags: <defaults>
</compile_context>

<pallas_src>
import math

import jax
import jax.numpy as jnp
from jax import lax
from jax.experimental import pallas as pl
from jax.experimental.pallas import tpu as pltpu


# ----------------------------------------------------------------------------
# Fused Pallas kernel
# ----------------------------------------------------------------------------
def _hypergraph_block_kernel(
    x_ref, ys0_ref, hs_ref, hm_ref, hc_ref,
    wq_ref, wk_ref, wv_ref, thm_ref, thc_ref,
    xupd_ref, ysl_ref, yml_ref, ycl_ref,
    xcat_ref, hcat_ref,
):
    f32 = jnp.float32
    NEG = f32(-1e30)  # finite mask bias: avoids -inf -> NaN in the softmax

    x = x_ref[...]                      # (n_samples, hidden)
    wq = wq_ref[...]                    # (hidden, dk)
    wk = wk_ref[...]                    # (hidden, dk)
    wv = wv_ref[...]                    # (hidden, d_out)
    dk = wq.shape[1]
    inv_scale = 1.0 / math.sqrt(float(dk))

    # Static row-block offsets for the in-VMEM concatenation.
    # (Demo shapes keep these multiples of 8 = sublane tile for clean stores.)
    n_s = hs_ref.shape[0]
    n_m = hm_ref.shape[0]
    n_c = hc_ref.shape[0]

    # --- shared projections of X (computed once, reused by both attentions) ---
    kx = jnp.dot(x, wk, preferred_element_type=f32)          # (n_samples, dk)
    vx = jnp.dot(x, wv, preferred_element_type=f32)          # (n_samples, d_out)
    qx = jnp.dot(x, wq, preferred_element_type=f32)          # (n_samples, dk)  (attention #2)

    # --- attention #1:  Y_s_l = attn(X, Y_s_0, H_s.T) --------------------------
    # scores (n_s, n_samples); mask orientation == H_s natively, no transpose needed.
    qs = jnp.dot(ys0_ref[...], wq, preferred_element_type=f32)          # (n_s, dk)
    s1 = lax.dot_general(qs, kx, (((1,), (1,)), ((), ())),
                         preferred_element_type=f32) * inv_scale        # (n_s, n_samples)
    hs = hs_ref[...]
    s1 = s1 + jnp.where(hs == 0.0, NEG, f32(0.0))
    m1 = jnp.max(s1, axis=-1, keepdims=True)
    e1 = jnp.exp(s1 - m1)
    p1 = e1 / jnp.sum(e1, axis=-1, keepdims=True)
    y_s_l = jnp.dot(p1, vx, preferred_element_type=f32)                 # (n_s, d_out)

    # --- propagation branches:  diag(1/deg) @ H @ X @ theta ---------------------
    # Scale the (small) output rows by 1/deg instead of rescaling H (fewer VPU mults).
    hm = hm_ref[...]
    tm = jnp.dot(hm, x, preferred_element_type=f32)                     # (n_m, hidden)
    y_m_l = jnp.dot(tm, thm_ref[...], preferred_element_type=f32)       # (n_m, d_out)
    y_m_l = y_m_l * (1.0 / jnp.sum(hm, axis=-1, keepdims=True))

    hc = hc_ref[...]
    tc = jnp.dot(hc, x, preferred_element_type=f32)                     # (n_c, hidden)
    y_c_l = jnp.dot(tc, thc_ref[...], preferred_element_type=f32)       # (n_c, d_out)
    y_c_l = y_c_l * (1.0 / jnp.sum(hc, axis=-1, keepdims=True))

    # --- write branch outputs & build the concatenated views in VMEM scratch ----
    ysl_ref[...] = y_s_l
    yml_ref[...] = y_m_l
    ycl_ref[...] = y_c_l

    xcat_ref[0:n_s, :] = y_s_l
    xcat_ref[n_s:n_s + n_m, :] = y_m_l
    xcat_ref[n_s + n_m:n_s + n_m + n_c, :] = y_c_l

    hcat_ref[0:n_s, :] = hs
    hcat_ref[n_s:n_s + n_m, :] = hm
    hcat_ref[n_s + n_m:n_s + n_m + n_c, :] = hc

    # --- attention #2:  X_updated = attn(X_cat, X, H_cat) -----------------------
    xcat = xcat_ref[...]                                                # (n_tot, d_out)
    kcat = jnp.dot(xcat, wk, preferred_element_type=f32)                # (n_tot, dk)
    vcat = jnp.dot(xcat, wv, preferred_element_type=f32)                # (n_tot, d_out)

    # Transposed score layout (n_tot, n_samples): s2[j, i] = score(query vertex i, edge j).
    # This keeps the H_cat mask in its native orientation (no transpose); softmax is
    # taken over the edge (sublane) axis.
    s2 = lax.dot_general(kcat, qx, (((1,), (1,)), ((), ())),
                         preferred_element_type=f32) * inv_scale        # (n_tot, n_samples)
    s2 = s2 + jnp.where(hcat_ref[...] == 0.0, NEG, f32(0.0))
    m2 = jnp.max(s2, axis=0, keepdims=True)
    e2 = jnp.exp(s2 - m2)
    p2 = e2 / jnp.sum(e2, axis=0, keepdims=True)                        # (n_tot, n_samples)

    # X_updated[i, :] = sum_j p2[j, i] * vcat[j, :]
    xupd_ref[...] = lax.dot_general(p2, vcat, (((0,), (0,)), ((), ())),
                                    preferred_element_type=f32)         # (n_samples, d_out)


# ----------------------------------------------------------------------------
# Wrapper (single pallas_call for the whole block)
# ----------------------------------------------------------------------------
def hypergraph_block_forward(params, X, Y_s_0, H_s, H_m, H_c):
    """Mirrors HypergraphBlock.forward as one fused Pallas kernel."""
    W_q, W_k, W_v = params["W_q"], params["W_k"], params["W_v"]
    theta_m, theta_c = params["theta_m"], params["theta_c"]

    n_samples, hidden = X.shape
    n_s, n_m, n_c = H_s.shape[0], H_m.shape[0], H_c.shape[0]
    n_tot = n_s + n_m + n_c
    dk = W_q.shape[1]
    d_out = W_v.shape[1]

    # Advisory cost estimate so XLA can schedule surrounding ops around the call.
    mm = lambda m, k, n: 2 * m * k * n
    flops = (
        2 * mm(n_samples, hidden, dk)                  # Q_x, K_x
        + mm(n_samples, hidden, d_out)                 # V_x
        + mm(n_s, hidden, dk)                          # Q_s
        + mm(n_s, dk, n_samples)                       # scores_1
        + mm(n_s, n_samples, d_out)                    # P_1 @ V_x
        + mm(n_m, n_samples, hidden) + mm(n_m, hidden, d_out)   # modality propagation
        + mm(n_c, n_samples, hidden) + mm(n_c, hidden, d_out)   # cluster propagation
        + mm(n_tot, d_out, dk) + mm(n_tot, d_out, d_out)         # K_cat, V_cat
        + mm(n_tot, dk, n_samples)                     # scores_2
        + mm(n_samples, n_tot, d_out)                  # P_2 @ V_cat
    )
    transcendentals = n_s * n_samples + n_tot * n_samples       # exp() in the softmaxes
    bytes_accessed = 4 * (
        X.size + Y_s_0.size + H_s.size + H_m.size + H_c.size
        + W_q.size + W_k.size + W_v.size + theta_m.size + theta_c.size
        + n_samples * d_out + n_tot * d_out
    )

    vmem = pl.BlockSpec(memory_space=pltpu.MemorySpace.VMEM)
    out_shape = (
        jax.ShapeDtypeStruct((n_samples, d_out), jnp.float32),   # X_updated
        jax.ShapeDtypeStruct((n_s, d_out), jnp.float32),         # Y_s_l
        jax.ShapeDtypeStruct((n_m, d_out), jnp.float32),         # Y_m_l
        jax.ShapeDtypeStruct((n_c, d_out), jnp.float32),         # Y_c_l
    )
    return pl.pallas_call(
        _hypergraph_block_kernel,
        out_shape=out_shape,
        in_specs=[vmem] * 10,
        out_specs=(vmem, vmem, vmem, vmem),
        scratch_shapes=[
            pltpu.VMEM((n_tot, d_out), jnp.float32),       # X_cat (VMEM only)
            pltpu.VMEM((n_tot, n_samples), jnp.float32),   # H_cat (VMEM only)
        ],
        compiler_params=pltpu.CompilerParams(vmem_limit_bytes=32 * 1024 * 1024),
        cost_estimate=pl.CostEstimate(
            flops=flops, transcendentals=transcendentals, bytes_accessed=bytes_accessed),
    )(X, Y_s_0, H_s, H_m, H_c, W_q, W_k, W_v, theta_m, theta_c)


# ----------------------------------------------------------------------------
# Pure-JAX reference (mirrors the PyTorch code exactly, for correctness check)
# ----------------------------------------------------------------------------
def _ref_attention(X, Y, H, Wq, Wk, Wv):
    Q = Y @ Wq
    K = X @ Wk
    s = Q @ K.T / jnp.sqrt(jnp.float32(K.shape[1]))
    s = jnp.where(H.T == 0, -jnp.inf, s)
    p = jax.nn.softmax(s, axis=-1)
    return p @ (X @ Wv)


def _ref_propagation(X, H, theta):
    D = jnp.sum(H, axis=0)
    return jnp.diag(1.0 / D) @ H.T @ X @ theta


def _ref_block(params, X, Y_s_0, H_s, H_m, H_c):
    Wq, Wk, Wv = params["W_q"], params["W_k"], params["W_v"]
    Y_s_l = _ref_attention(X, Y_s_0, H_s.T, Wq, Wk, Wv)
    Y_m_l = _ref_propagation(X, H_m.T, params["theta_m"])
    Y_c_l = _ref_propagation(X, H_c.T, params["theta_c"])
    X_cat = jnp.concatenate([Y_s_l, Y_m_l, Y_c_l], axis=0)
    H_cat = jnp.concatenate([H_s, H_m, H_c], axis=0)
    X_updated = _ref_attention(X_cat, X, H_cat, Wq, Wk, Wv)
    return X_updated, Y_s_l, Y_m_l, Y_c_l


# ----------------------------------------------------------------------------
# Deterministic parameters / inputs
# ----------------------------------------------------------------------------
def _xavier_uniform(key, shape):
    fan_in, fan_out = shape
    bound = math.sqrt(6.0 / (fan_in + fan_out))
    return jax.random.uniform(key, shape, jnp.float32, -bound, bound)


if __name__ == "__main__":
    # input_dim = hidden_dim = output_dim (required by the PyTorch forward to type-check).
    hidden = 32
    dk = 16
    n_samples = 16
    # Edge counts chosen as multiples of 8 so the in-kernel row-block scratch writes are
    # sublane-tile aligned.
    n_edges_s, n_edges_m, n_edges_c = 8, 8, 8

    key = jax.random.PRNGKey(0)
    keys = jax.random.split(key, 8)

    params = {
        "W_q": _xavier_uniform(keys[0], (hidden, dk)),
        "W_k": _xavier_uniform(keys[1], (hidden, dk)),
        "W_v": _xavier_uniform(keys[2], (hidden, hidden)),
        "theta_m": _xavier_uniform(keys[3], (hidden, hidden)),
        "theta_c": _xavier_uniform(keys[4], (hidden, hidden)),
    }

    X = jax.random.normal(keys[5], (n_samples, hidden), jnp.float32)
    Y_s_0 = jax.random.normal(keys[6], (n_edges_s, hidden), jnp.float32)

    # Binary incidence matrices (n_edges, n_samples); every edge has >=1 vertex and every
    # vertex belongs to >=1 edge, so no softmax row is fully masked and no degree is zero.
    H_s = jax.random.bernoulli(keys[7], 0.4, (n_edges_s, n_samples)).astype(jnp.float32)
    edge_ids = jnp.arange(n_edges_s)
    H_s = H_s.at[edge_ids, 2 * edge_ids].set(1.0)
    H_s = H_s.at[edge_ids, 2 * edge_ids + 1].set(1.0)

    v = jnp.arange(n_samples)
    H_m = jnp.zeros((n_edges_m, n_samples), jnp.float32).at[v % n_edges_m, v].set(1.0)
    H_c = jnp.zeros((n_edges_c, n_samples), jnp.float32).at[
        v // (n_samples // n_edges_c), v].set(1.0)

    fwd = jax.jit(hypergraph_block_forward)
    outs = fwd(params, X, Y_s_0, H_s, H_m, H_c)
    outs = jax.block_until_ready(outs)

    refs = _ref_block(params, X, Y_s_0, H_s, H_m, H_c)
    for got, want in zip(outs, refs):
        assert got.shape == want.shape and got.dtype == jnp.float32
        assert jnp.allclose(got, want, atol=1e-4, rtol=1e-4), "mismatch vs reference"

    print("KERNEL_OK")
</pallas_src>

<mosaic_0001>
module attributes {stable_mosaic.version = 11 : i64} {
  func.func @_hypergraph_block_kernel(%arg0: memref<16x32xf32, #tpu.memory_space<vmem>>, %arg1: memref<8x32xf32, #tpu.memory_space<vmem>>, %arg2: memref<8x16xf32, #tpu.memory_space<vmem>>, %arg3: memref<8x16xf32, #tpu.memory_space<vmem>>, %arg4: memref<8x16xf32, #tpu.memory_space<vmem>>, %arg5: memref<32x16xf32, #tpu.memory_space<vmem>>, %arg6: memref<32x16xf32, #tpu.memory_space<vmem>>, %arg7: memref<32x32xf32, #tpu.memory_space<vmem>>, %arg8: memref<32x32xf32, #tpu.memory_space<vmem>>, %arg9: memref<32x32xf32, #tpu.memory_space<vmem>>, %arg10: memref<16x32xf32, #tpu.memory_space<vmem>>, %arg11: memref<8x32xf32, #tpu.memory_space<vmem>>, %arg12: memref<8x32xf32, #tpu.memory_space<vmem>>, %arg13: memref<8x32xf32, #tpu.memory_space<vmem>>, %arg14: memref<24x32xf32, #tpu.memory_space<vmem>>, %arg15: memref<24x16xf32, #tpu.memory_space<vmem>>) attributes {dimension_semantics = [], scalar_prefetch = 0 : i64, scratch_operands = 2 : i64, tpu.core_type = #tpu.core_type<tc>} {
    %c0 = arith.constant 0 : index
    %c0_0 = arith.constant 0 : index
    %0 = vector.load %arg0[%c0, %c0_0] : memref<16x32xf32, #tpu.memory_space<vmem>>, vector<16x32xf32>
    %c0_1 = arith.constant 0 : index
    %c0_2 = arith.constant 0 : index
    %1 = vector.load %arg5[%c0_1, %c0_2] : memref<32x16xf32, #tpu.memory_space<vmem>>, vector<32x16xf32>
    %c0_3 = arith.constant 0 : index
    %c0_4 = arith.constant 0 : index
    %2 = vector.load %arg6[%c0_3, %c0_4] : memref<32x16xf32, #tpu.memory_space<vmem>>, vector<32x16xf32>
    %c0_5 = arith.constant 0 : index
    %c0_6 = arith.constant 0 : index
    %3 = vector.load %arg7[%c0_5, %c0_6] : memref<32x32xf32, #tpu.memory_space<vmem>>, vector<32x32xf32>
    %cst = arith.constant dense<0.000000e+00> : vector<16x16xf32>
    %4 = tpu.matmul %0, %2, %cst {dimension_numbers = #tpu.dot_dimension_numbers<[1], [0], [0], [1], [0, 0, 1, 1], [], []>} : vector<16x32xf32>, vector<32x16xf32>, vector<16x16xf32> -> vector<16x16xf32>
    %cst_7 = arith.constant dense<0.000000e+00> : vector<16x32xf32>
    %5 = tpu.matmul %0, %3, %cst_7 {dimension_numbers = #tpu.dot_dimension_numbers<[1], [0], [0], [1], [0, 0, 1, 1], [], []>} : vector<16x32xf32>, vector<32x32xf32>, vector<16x32xf32> -> vector<16x32xf32>
    %cst_8 = arith.constant dense<0.000000e+00> : vector<16x16xf32>
    %6 = tpu.matmul %0, %1, %cst_8 {dimension_numbers = #tpu.dot_dimension_numbers<[1], [0], [0], [1], [0, 0, 1, 1], [], []>} : vector<16x32xf32>, vector<32x16xf32>, vector<16x16xf32> -> vector<16x16xf32>
    %c0_9 = arith.constant 0 : index
    %c0_10 = arith.constant 0 : index
    %7 = vector.load %arg1[%c0_9, %c0_10] : memref<8x32xf32, #tpu.memory_space<vmem>>, vector<8x32xf32>
    %cst_11 = arith.constant dense<0.000000e+00> : vector<8x16xf32>
    %8 = tpu.matmul %7, %1, %cst_11 {dimension_numbers = #tpu.dot_dimension_numbers<[1], [0], [0], [1], [0, 0, 1, 1], [], []>} : vector<8x32xf32>, vector<32x16xf32>, vector<8x16xf32> -> vector<8x16xf32>
    %cst_12 = arith.constant dense<0.000000e+00> : vector<8x16xf32>
    %9 = tpu.matmul %8, %4, %cst_12 {dimension_numbers = #tpu.dot_dimension_numbers<[1], [1], [0], [0], [0, 0, 1, 0], [], []>} : vector<8x16xf32>, vector<16x16xf32>, vector<8x16xf32> -> vector<8x16xf32>
    %cst_13 = arith.constant 2.500000e-01 : f32
    %10 = vector.broadcast %cst_13 : f32 to vector<8x16xf32>
    %11 = arith.mulf %9, %10 : vector<8x16xf32>
    %c0_14 = arith.constant 0 : index
    %c0_15 = arith.constant 0 : index
    %12 = vector.load %arg2[%c0_14, %c0_15] : memref<8x16xf32, #tpu.memory_space<vmem>>, vector<8x16xf32>
    %cst_16 = arith.constant 0.000000e+00 : f32
    %13 = vector.broadcast %cst_16 : f32 to vector<8x16xf32>
    %14 = arith.cmpf oeq, %12, %13 : vector<8x16xf32>
    %cst_17 = arith.constant -1.000000e+30 : f32
    %cst_18 = arith.constant 0.000000e+00 : f32
    %15 = vector.broadcast %cst_17 : f32 to vector<8x16xf32>
    %16 = vector.broadcast %cst_18 : f32 to vector<8x16xf32>
    %17 = arith.select %14, %15, %16 : vector<8x16xi1>, vector<8x16xf32>
    %18 = arith.addf %11, %17 : vector<8x16xf32>
    %cst_19 = arith.constant dense<0xFF800000> : vector<8xf32>
    %19 = vector.multi_reduction <maximumf>, %18, %cst_19 [1] : vector<8x16xf32> to vector<8xf32>
    %20 = vector.shape_cast %19 : vector<8xf32> to vector<8x1xf32>
    %21 = vector.broadcast %20 : vector<8x1xf32> to vector<8x16xf32>
    %22 = arith.subf %18, %21 : vector<8x16xf32>
    %23 = math.exp %22 : vector<8x16xf32>
    %cst_20 = arith.constant dense<0.000000e+00> : vector<8xf32>
    %24 = vector.multi_reduction <add>, %23, %cst_20 [1] : vector<8x16xf32> to vector<8xf32>
    %25 = vector.shape_cast %24 : vector<8xf32> to vector<8x1xf32>
    %26 = vector.broadcast %25 : vector<8x1xf32> to vector<8x16xf32>
    %27 = arith.divf %23, %26 : vector<8x16xf32>
    %cst_21 = arith.constant dense<0.000000e+00> : vector<8x32xf32>
    %28 = tpu.matmul %27, %5, %cst_21 {dimension_numbers = #tpu.dot_dimension_numbers<[1], [0], [0], [1], [0, 0, 1, 1], [], []>} : vector<8x16xf32>, vector<16x32xf32>, vector<8x32xf32> -> vector<8x32xf32>
    %c0_22 = arith.constant 0 : index
    %c0_23 = arith.constant 0 : index
    %29 = vector.load %arg3[%c0_22, %c0_23] : memref<8x16xf32, #tpu.memory_space<vmem>>, vector<8x16xf32>
    %cst_24 = arith.constant dense<0.000000e+00> : vector<8x32xf32>
    %30 = tpu.matmul %29, %0, %cst_24 {dimension_numbers = #tpu.dot_dimension_numbers<[1], [0], [0], [1], [0, 0, 1, 1], [], []>} : vector<8x16xf32>, vector<16x32xf32>, vector<8x32xf32> -> vector<8x32xf32>
    %c0_25 = arith.constant 0 : index
    %c0_26 = arith.constant 0 : index
    %31 = vector.load %arg8[%c0_25, %c0_26] : memref<32x32xf32, #tpu.memory_space<vmem>>, vector<32x32xf32>
    %cst_27 = arith.constant dense<0.000000e+00> : vector<8x32xf32>
    %32 = tpu.matmul %30, %31, %cst_27 {dimension_numbers = #tpu.dot_dimension_numbers<[1], [0], [0], [1], [0, 0, 1, 1], [], []>} : vector<8x32xf32>, vector<32x32xf32>, vector<8x32xf32> -> vector<8x32xf32>
    %cst_28 = arith.constant dense<0.000000e+00> : vector<8xf32>
    %33 = vector.multi_reduction <add>, %29, %cst_28 [1] : vector<8x16xf32> to vector<8xf32>
    %34 = vector.shape_cast %33 : vector<8xf32> to vector<8x1xf32>
    %cst_29 = arith.constant 1.000000e+00 : f32
    %35 = vector.broadcast %cst_29 : f32 to vector<8x1xf32>
    %36 = arith.divf %35, %34 : vector<8x1xf32>
    %37 = vector.broadcast %36 : vector<8x1xf32> to vector<8x32xf32>
    %38 = arith.mulf %32, %37 : vector<8x32xf32>
    %c0_30 = arith.constant 0 : index
    %c0_31 = arith.constant 0 : index
    %39 = vector.load %arg4[%c0_30, %c0_31] : memref<8x16xf32, #tpu.memory_space<vmem>>, vector<8x16xf32>
    %cst_32 = arith.constant dense<0.000000e+00> : vector<8x32xf32>
    %40 = tpu.matmul %39, %0, %cst_32 {dimension_numbers = #tpu.dot_dimension_numbers<[1], [0], [0], [1], [0, 0, 1, 1], [], []>} : vector<8x16xf32>, vector<16x32xf32>, vector<8x32xf32> -> vector<8x32xf32>
    %c0_33 = arith.constant 0 : index
    %c0_34 = arith.constant 0 : index
    %41 = vector.load %arg9[%c0_33, %c0_34] : memref<32x32xf32, #tpu.memory_space<vmem>>, vector<32x32xf32>
    %cst_35 = arith.constant dense<0.000000e+00> : vector<8x32xf32>
    %42 = tpu.matmul %40, %41, %cst_35 {dimension_numbers = #tpu.dot_dimension_numbers<[1], [0], [0], [1], [0, 0, 1, 1], [], []>} : vector<8x32xf32>, vector<32x32xf32>, vector<8x32xf32> -> vector<8x32xf32>
    %cst_36 = arith.constant dense<0.000000e+00> : vector<8xf32>
    %43 = vector.multi_reduction <add>, %39, %cst_36 [1] : vector<8x16xf32> to vector<8xf32>
    %44 = vector.shape_cast %43 : vector<8xf32> to vector<8x1xf32>
    %cst_37 = arith.constant 1.000000e+00 : f32
    %45 = vector.broadcast %cst_37 : f32 to vector<8x1xf32>
    %46 = arith.divf %45, %44 : vector<8x1xf32>
    %47 = vector.broadcast %46 : vector<8x1xf32> to vector<8x32xf32>
    %48 = arith.mulf %42, %47 : vector<8x32xf32>
    %c0_38 = arith.constant 0 : index
    %c0_39 = arith.constant 0 : index
    %49 = vector.load %arg11[%c0_38, %c0_39] : memref<8x32xf32, #tpu.memory_space<vmem>>, vector<8x32xf32>
    tpu.vector_store %arg11[%c0_38, %c0_39], %28 {strides = array<i32>} : memref<8x32xf32, #tpu.memory_space<vmem>>, vector<8x32xf32>,
    %c0_40 = arith.constant 0 : index
    %c0_41 = arith.constant 0 : index
    %50 = vector.load %arg12[%c0_40, %c0_41] : memref<8x32xf32, #tpu.memory_space<vmem>>, vector<8x32xf32>
    tpu.vector_store %arg12[%c0_40, %c0_41], %38 {strides = array<i32>} : memref<8x32xf32, #tpu.memory_space<vmem>>, vector<8x32xf32>,
    %c0_42 = arith.constant 0 : index
    %c0_43 = arith.constant 0 : index
    %51 = vector.load %arg13[%c0_42, %c0_43] : memref<8x32xf32, #tpu.memory_space<vmem>>, vector<8x32xf32>
    tpu.vector_store %arg13[%c0_42, %c0_43], %48 {strides = array<i32>} : memref<8x32xf32, #tpu.memory_space<vmem>>, vector<8x32xf32>,
    %c0_44 = arith.constant 0 : index
    %c0_45 = arith.constant 0 : index
    %52 = vector.load %arg14[%c0_44, %c0_45] : memref<24x32xf32, #tpu.memory_space<vmem>>, vector<8x32xf32>
    tpu.vector_store %arg14[%c0_44, %c0_45], %28 {strides = array<i32>} : memref<24x32xf32, #tpu.memory_space<vmem>>, vector<8x32xf32>,
    %c8 = arith.constant 8 : index
    %c0_46 = arith.constant 0 : index
    %53 = vector.load %arg14[%c8, %c0_46] : memref<24x32xf32, #tpu.memory_space<vmem>>, vector<8x32xf32>
    tpu.vector_store %arg14[%c8, %c0_46], %38 {strides = array<i32>} : memref<24x32xf32, #tpu.memory_space<vmem>>, vector<8x32xf32>,
    %c16 = arith.constant 16 : index
    %c0_47 = arith.constant 0 : index
    %54 = vector.load %arg14[%c16, %c0_47] : memref<24x32xf32, #tpu.memory_space<vmem>>, vector<8x32xf32>
    tpu.vector_store %arg14[%c16, %c0_47], %48 {strides = array<i32>} : memref<24x32xf32, #tpu.memory_space<vmem>>, vector<8x32xf32>,
    %c0_48 = arith.constant 0 : index
    %c0_49 = arith.constant 0 : index
    %55 = vector.load %arg15[%c0_48, %c0_49] : memref<24x16xf32, #tpu.memory_space<vmem>>, vector<8x16xf32>
    tpu.vector_store %arg15[%c0_48, %c0_49], %12 {strides = array<i32>} : memref<24x16xf32, #tpu.memory_space<vmem>>, vector<8x16xf32>,
    %c8_50 = arith.constant 8 : index
    %c0_51 = arith.constant 0 : index
    %56 = vector.load %arg15[%c8_50, %c0_51] : memref<24x16xf32, #tpu.memory_space<vmem>>, vector<8x16xf32>
    tpu.vector_store %arg15[%c8_50, %c0_51], %29 {strides = array<i32>} : memref<24x16xf32, #tpu.memory_space<vmem>>, vector<8x16xf32>,
    %c16_52 = arith.constant 16 : index
    %c0_53 = arith.constant 0 : index
    %57 = vector.load %arg15[%c16_52, %c0_53] : memref<24x16xf32, #tpu.memory_space<vmem>>, vector<8x16xf32>
    tpu.vector_store %arg15[%c16_52, %c0_53], %39 {strides = array<i32>} : memref<24x16xf32, #tpu.memory_space<vmem>>, vector<8x16xf32>,
    %c0_54 = arith.constant 0 : index
    %c0_55 = arith.constant 0 : index
    %58 = vector.load %arg14[%c0_54, %c0_55] : memref<24x32xf32, #tpu.memory_space<vmem>>, vector<24x32xf32>
    %cst_56 = arith.constant dense<0.000000e+00> : vector<24x16xf32>
    %59 = tpu.matmul %58, %2, %cst_56 {dimension_numbers = #tpu.dot_dimension_numbers<[1], [0], [0], [1], [0, 0, 1, 1], [], []>} : vector<24x32xf32>, vector<32x16xf32>, vector<24x16xf32> -> vector<24x16xf32>
    %cst_57 = arith.constant dense<0.000000e+00> : vector<24x32xf32>
    %60 = tpu.matmul %58, %3, %cst_57 {dimension_numbers = #tpu.dot_dimension_numbers<[1], [0], [0], [1], [0, 0, 1, 1], [], []>} : vector<24x32xf32>, vector<32x32xf32>, vector<24x32xf32> -> vector<24x32xf32>
    %cst_58 = arith.constant dense<0.000000e+00> : vector<24x16xf32>
    %61 = tpu.matmul %59, %6, %cst_58 {dimension_numbers = #tpu.dot_dimension_numbers<[1], [1], [0], [0], [0, 0, 1, 0], [], []>} : vector<24x16xf32>, vector<16x16xf32>, vector<24x16xf32> -> vector<24x16xf32>
    %cst_59 = arith.constant 2.500000e-01 : f32
    %62 = vector.broadcast %cst_59 : f32 to vector<24x16xf32>
    %63 = arith.mulf %61, %62 : vector<24x16xf32>
    %c0_60 = arith.constant 0 : index
    %c0_61 = arith.constant 0 : index
    %64 = vector.load %arg15[%c0_60, %c0_61] : memref<24x16xf32, #tpu.memory_space<vmem>>, vector<24x16xf32>
    %cst_62 = arith.constant 0.000000e+00 : f32
    %65 = vector.broadcast %cst_62 : f32 to vector<24x16xf32>
    %66 = arith.cmpf oeq, %64, %65 : vector<24x16xf32>
    %cst_63 = arith.constant -1.000000e+30 : f32
    %cst_64 = arith.constant 0.000000e+00 : f32
    %67 = vector.broadcast %cst_63 : f32 to vector<24x16xf32>
    %68 = vector.broadcast %cst_64 : f32 to vector<24x16xf32>
    %69 = arith.select %66, %67, %68 : vector<24x16xi1>, vector<24x16xf32>
    %70 = arith.addf %63, %69 : vector<24x16xf32>
    %cst_65 = arith.constant dense<0xFF800000> : vector<16xf32>
    %71 = vector.multi_reduction <maximumf>, %70, %cst_65 [0] : vector<24x16xf32> to vector<16xf32>
    %72 = vector.shape_cast %71 : vector<16xf32> to vector<1x16xf32>
    %73 = vector.broadcast %72 : vector<1x16xf32> to vector<24x16xf32>
    %74 = arith.subf %70, %73 : vector<24x16xf32>
    %75 = math.exp %74 : vector<24x16xf32>
    %cst_66 = arith.constant dense<0.000000e+00> : vector<16xf32>
    %76 = vector.multi_reduction <add>, %75, %cst_66 [0] : vector<24x16xf32> to vector<16xf32>
    %77 = vector.shape_cast %76 : vector<16xf32> to vector<1x16xf32>
    %78 = vector.broadcast %77 : vector<1x16xf32> to vector<24x16xf32>
    %79 = arith.divf %75, %78 : vector<24x16xf32>
    %cst_67 = arith.constant dense<0.000000e+00> : vector<16x32xf32>
    %80 = tpu.matmul %79, %60, %cst_67 {dimension_numbers = #tpu.dot_dimension_numbers<[0], [0], [1], [1], [0, 1, 1, 1], [], []>} : vector<24x16xf32>, vector<24x32xf32>, vector<16x32xf32> -> vector<16x32xf32>
    %c0_68 = arith.constant 0 : index
    %c0_69 = arith.constant 0 : index
    %81 = vector.load %arg10[%c0_68, %c0_69] : memref<16x32xf32, #tpu.memory_space<vmem>>, vector<16x32xf32>
    tpu.vector_store %arg10[%c0_68, %c0_69], %80 {strides = array<i32>} : memref<16x32xf32, #tpu.memory_space<vmem>>, vector<16x32xf32>,
    return
  }
}

</mosaic_0001>

<bundles_post_ra>
// kernel: hypergraph_block_forward.1
= control target key start
LH: loop header
LB: loop body
LE: loop exit
PB: predicated region body
PF: predicated region fallthrough
CT: control target
= control target key end

     0   :  { %19 = vsyncpa [#allocation5], 0  ;;  %s2231_s0 = inlined_call_operand.vmem [shape: f32[16,32], index: 0, kind: input, shape index: {}]   ;;  %s2232_s1 = inlined_call_operand.hbm [shape: f32[8,32], index: 1, kind: input, shape index: {}]   ;;  %s2233_s2 = inlined_call_operand.vmem [shape: f32[8,16], index: 2, kind: input, shape index: {}]   ;;  %s2234_s3 = inlined_call_operand.hbm [shape: f32[8,16], index: 3, kind: input, shape index: {}]   ;;  %s2235_s4 = inlined_call_operand.vmem [shape: f32[8,16], index: 4, kind: input, shape index: {}]   ;;  %s2236_s5 = inlined_call_operand.vmem [shape: f32[32,16], index: 5, kind: input, shape index: {}]   ;;  %s2237_s6 = inlined_call_operand.vmem [shape: f32[32,16], index: 6, kind: input, shape index: {}]   ;;  %s2238_s7 = inlined_call_operand.vmem [shape: f32[32,32], index: 7, kind: input, shape index: {}]   ;;  %s2239_s8 = inlined_call_operand.vmem [shape: f32[32,32], index: 8, kind: input, shape index: {}]   ;;  %s2240_s9 = inlined_call_operand.vmem [shape: f32[32,32], index: 9, kind: input, shape index: {}]   ;;  %s2241_s10 = inlined_call_operand.hbm [shape: f32[16,32], index: 10, kind: output, shape index: {0}]   ;;  %s2242_s11 = inlined_call_operand.hbm [shape: f32[8,32], index: 11, kind: output, shape index: {1}]   ;;  %s2243_s12 = inlined_call_operand.hbm [shape: f32[8,32], index: 12, kind: output, shape index: {2}]   ;;  %s2244_s13 = inlined_call_operand.hbm [shape: f32[8,32], index: 13, kind: output, shape index: {3}]  }
   0x1   :  { %20 = vsyncpa [#allocation8], 0 }
   0x2   :  { %21 = vsyncpa [#allocation6], 0 }
   0x3   :  { %22 = vsyncpa [#allocation11], 0 }
   0x4   :  { %23 = vsyncpa [#allocation14], 0  ;;  %s1861_s25 = smov [#allocation4]   ;;  %s1862_s27 = smov [#allocation7]  }
   0x5   :  { %s32_s26 = sshll.u32 %s1861_s25, 4  ;;  %s44_s28 = sshll.u32 %s1862_s27, 4  ;;  %s33_s26 = int_to_ptr.vmem [resolvable:$true] %s32_s26  ;;  %s45_s28 = int_to_ptr.vmem [resolvable:$true] %s44_s28 }
   0x6   :  { %s1719_s14 = scalar_lea.hbm %s2232_s1, 128 }
   0x7   :  { %p1720_p0 = scmp.ne.s32.totalorder %s2232_s1, %s1719_s14  ;;  %p1723_p1 = scmp.lt.u32.totalorder %s1719_s14, %s2232_s1 }
   0x9   :  { %p1725_p2 = pnand %p1723_p1, %p1720_p0 }
   0xb   :  { %1728 = shalt.err (!%p1725_p2)
}
   0xc   :  { %s1729_s19 = scalar_lea.vmem %s33_s26, 128  ;;  %p1734_p4 = scmp.lt.s32.totalorder %s33_s26, %s33_s26 }
   0xd   :  { %p1730_p3 = scmp.ne.s32.totalorder %s33_s26, %s1729_s19  ;;  %p1735_p5 = scmp.lt.s32.totalorder %s1729_s19, %s1729_s19 }
   0xf   :  { %p1736_p6 = por %p1735_p5, %p1734_p4 }
  0x11   :  { %p1737_p7 = pnand %p1736_p6, %p1730_p3 }
  0x13   :  { %1740 = shalt.err (!%p1737_p7)
}
  0x14   :  { %35 = dma.hbm_to_vmem [thread:$0]  %s2232_s1, 128, %s33_s26, [#allocation5]  }
  0x15   :  { %s1741_s24 = scalar_lea.hbm %s2234_s3, 128 }
  0x16   :  { %p1742_p8 = scmp.ne.s32.totalorder %s2234_s3, %s1741_s24  ;;  %p1745_p9 = scmp.lt.u32.totalorder %s1741_s24, %s2234_s3 }
  0x18   :  { %p1747_p10 = pnand %p1745_p9, %p1742_p8 }
  0x1a   :  { %1750 = shalt.err (!%p1747_p10)
}
  0x1b   :  { %s1751_s14 = scalar_lea.vmem %s45_s28, 128  ;;  %p1756_p12 = scmp.lt.s32.totalorder %s45_s28, %s45_s28 }
  0x1c   :  { %p1752_p11 = scmp.ne.s32.totalorder %s45_s28, %s1751_s14  ;;  %p1757_p13 = scmp.lt.s32.totalorder %s1751_s14, %s1751_s14 }
  0x1e   :  { %p1758_p0 = por %p1757_p13, %p1756_p12 }
  0x20   :  { %p1759_p1 = pnand %p1758_p0, %p1752_p11 }
  0x22   :  { %1762 = shalt.err (!%p1759_p1)
}
  0x23   :  { %47 = dma.hbm_to_vmem [thread:$0]  %s2234_s3, 128, %s45_s28, [#allocation8]  }
  0x24   :  { %1851 = dma.done.wait [#allocation5], 128  }
  0x25   :  { %1852 = vsyncadd [#allocation5], 4294967168 }
  0x26   :  { %1853 = dma.done.wait [#allocation8], 128  }
  0x27   :  { %1854 = vsyncadd [#allocation8], 4294967168  ;;  %v72_v0 = vld [vmem:[%s2237_s6] sm:$0xff]  ;;  %v73_v1 = vld [vmem:[%s2237_s6 + $0x8] sm:$0xff]  ;;  %vm80_vm0 = vcmask 261120   ;;  %v1863_v19 = vmov 0.0|0.0  }
  0x28   :  { %v76_v2 = vld [vmem:[%s2238_s7] sm:$0xff]  ;;  %v1975_v3 = vpack.c.bf16 %v73_v1, %v72_v0  ;;  %v77_v4 = vld [vmem:[%s2238_s7 + $0x8] sm:$0xff]  ;;  %v74_v5 = vld [vmem:[%s2237_s6 + $0x10] sm:$0xff]  ;;  %vm1864_vm1 = vmmov 0   ;;  %v1865_v21 = vmov 0.0   ;;  %vm386_vm2 = vcmask 130048  }
  0x29   :  { %v75_v6 = vld [vmem:[%s2237_s6 + $0x18] sm:$0xff]  ;;  %v1986_v7 = vpack.c.bf16 %v77_v4, %v76_v2  ;;  %v78_v9 = vld [vmem:[%s2238_s7 + $0x10] sm:$0xff]  ;;  %v1999_v11 = vld [vmem:[%s2231_s0] sm:$0xff]  ;;  %vm1227_vm8 = vcmask 195584  }
  0x2a   :  { %v1988_v8 = vpack.c.bf16 %v75_v6, %v74_v5  ;;  %v79_v10 = vld [vmem:[%s2238_s7 + $0x18] sm:$0xff]  ;;  %1618 = vmatprep.subr.bf16.mxu0 %v1975_v3  ;;  %1475 = vmatprep.mubr.msk.f32.mxu0 %vm80_vm0, %v1999_v11  ;;  %v68_v13 = vld [vmem:[%s2236_s5] sm:$0xff]  ;;  %v69_v14 = vld [vmem:[%s2236_s5 + $0x8] sm:$0xff] }
  0x2b   :  { %v2002_v12 = vpack.c.bf16 %v79_v10, %v78_v9  ;;  %1620 = vmatpush3.bf16.msra.mxu0 %v1975_v3  ;;  %1626 = vmatprep.subr.bf16.mxu1 %v1986_v7  ;;  %v1633_v15 = vpack.c.bf16 %v69_v14, %v68_v13  ;;  %v2023_v16 = vld [vmem:[%s2231_s0 + $0x8] sm:$0xff]  ;;  %v70_v17 = vld [vmem:[%s2236_s5 + $0x10] sm:$0xff]  ;;  %v71_v18 = vld [vmem:[%s2236_s5 + $0x18] sm:$0xff] }
  0x2c   :  { %1628 = vmatpush3.bf16.msra.mxu1 %v1986_v7  ;;  %1622 = vmatprep.subr.bf16.mxu0 %v1988_v8  ;;  %v1637_v20 = vpack.c.bf16 %v71_v18, %v70_v17  ;;  %v312_v22 = vld [vmem:[#allocation4] sm:$0xff]  ;;  %vm2053_vm3 = vmpackc.low %vm386_vm2, %vm386_vm2  ;;  %v467_v35 = vld [vmem:[%s2233_s2] sm:$0xff]  ;;  %v1655_v54 = vpack.c.bf16 %v2023_v16, %v1999_v11 }
  0x2d   :  { %1630 = vmatprep.subr.bf16.mxu1 %v2002_v12  ;;  %1486 = vmatprep.mubr.msk.f32.mxu1 %vm80_vm0, %v1999_v11  ;;  %875 = vst.msk [vmem:[#allocation3] sm:$0xff] %vm386_vm2, %v467_v35  ;;  %vm468_vm4 = vcmp.eq.f32.partialorder %v467_v35, 0.0  ;;  %v555_v47 = vld [vmem:[#allocation7] sm:$0xff]  ;;  %v712_v48 = vld [vmem:[%s2235_s4] sm:$0xff]  ;;  %v630_v50 = vld [vmem:[%s2239_s8 + $0x8] sm:$0xff] }
  0x2e   :  { %v469_v37 = vsel %vm468_vm4, -1e+30, %v1865_v21  ;;  %876 = vst.msk [vmem:[#allocation3 + $0x8] sm:$0xff] %vm386_vm2, %v555_v47  ;;  %877 = vst.msk [vmem:[#allocation3 + $0x10] sm:$0xff] %vm386_vm2, %v712_v48  ;;  %v629_v49 = vld [vmem:[%s2239_s8] sm:$0xff]  ;;  %v631_v56 = vld [vmem:[%s2239_s8 + $0x10] sm:$0xff] }
  0x2f   :  { %1624 = vmatpush3.bf16.msra.mxu0 %v1988_v8  ;;  %v1658_v51 = vpack.c.bf16 %v630_v50, %v629_v49  ;;  %v632_v57 = vld [vmem:[%s2239_s8 + $0x18] sm:$0xff]  ;;  %v786_v58 = vld [vmem:[%s2240_s9] sm:$0xff]  ;;  %v787_v60 = vld [vmem:[%s2240_s9 + $0x8] sm:$0xff]  ;;  %v706_v1 = vsel %vm386_vm2, %v555_v47, 0.0  ;;  %v863_v2 = vsel %vm386_vm2, %v712_v48, 0.0 }
  0x30   :  { %1632 = vmatpush3.bf16.msra.mxu1 %v2002_v12  ;;  %1634 = vmatprep.subr.bf16.mxu0 %v1633_v15  ;;  %v1661_v59 = vpack.c.bf16 %v632_v57, %v631_v56  ;;  %v1667_v61 = vpack.c.bf16 %v787_v60, %v786_v58  ;;  %v788_v62 = vld [vmem:[%s2240_s9 + $0x10] sm:$0xff]  ;;  %v789_v63 = vld [vmem:[%s2240_s9 + $0x18] sm:$0xff]  ;;  %s1866_s9 = smov [#allocation10]  }
  0x31   :  { %1641 = vmatprep.subr.bf16.mxu1 %v1863_v19  ;;  %v1670_v0 = vpack.c.bf16 %v789_v63, %v788_v62  ;;  %707 = vadd.xlane.f32.xlu1 %v706_v1  ;;  %s1329_s16 = sshll.u32 %s1866_s9, 4  ;;  %s1330_s16 = int_to_ptr.vmem [resolvable:$true] %s1329_s16 }
  0x32   :  { %1476 = vmatmul.mubr.msk.f32.vlgmr.msra.gmra.mrb[0].mxu0 %vm80_vm0, %v2023_v16  ;;  %s1763_s17 = scalar_lea.vmem %s1330_s16, 128  ;;  %p1768_p3 = scmp.lt.s32.totalorder %s1330_s16, %s1330_s16 }
  0x33   :  { %1487 = vmatmul.mubr.msk.f32.vlgmr.msra.gmra.mrb[0].mxu1 %vm80_vm0, %v2023_v16  ;;  %1636 = vmatpush3.bf16.msra.mxu0 %v1633_v15  ;;  %p1764_p2 = scmp.ne.s32.totalorder %s1330_s16, %s1763_s17  ;;  %p1769_p4 = scmp.lt.s32.totalorder %s1763_s17, %s1763_s17 }
  0x34   :  { %1643 = vmatpush3.bf16.msra.mxu1 %v1633_v15  ;;  %1508 = vmatprep.mubr.msk.f32.mxu1 %vm1864_vm1, %v1865_v21 }
  0x35   :  { %1644 = vmatprep.subr.bf16.mxu1 %v1863_v19  ;;  %1638 = vmatprep.subr.bf16.mxu0 %v1637_v20  ;;  %p1770_p5 = por %p1769_p4, %p1768_p3 }
  0x36   :  { %1497 = vmatprep.mubr.msk.f32.mxu0 %vm80_vm0, %v1999_v11  ;;  %864 = vadd.xlane.f32.xlu1 %v863_v2 }
  0x37   :  { %1640 = vmatpush3.bf16.msra.mxu0 %v1637_v20  ;;  %p1771_p6 = pnand %p1770_p5, %p1764_p2 }
  0x38   :  { %1646 = vmatpush3.bf16.msra.mxu1 %v1637_v20  ;;  %1647 = vmatprep.subr.bf16.mxu0 %v1863_v19 }
  0x39   :  { %1651 = vmatprep.subr.bf16.mxu1 %v1863_v19 }
  0x3a   :  { %1498 = vmatmul.mubr.msk.f32.vlgmr.msra.gmra.mrb[2].mxu0 %vm80_vm0, %v2023_v16 }
  0x3b   :  { %1509 = vmatmul.mubr.msk.f32.vlgmr.msra.gmra.mrb[2].mxu1 %vm80_vm0, %v312_v22  ;;  %1515 = vmatprep.mubr.msk.f32.mxu0 %vm1864_vm1, %v1865_v21 }
  0x3c   :  { %1522 = vmatprep.mubr.msk.f32.mxu1 %vm1864_vm1, %v1865_v21 }
 0x105   :  { %v1477_v23 = vpop.f32.mrb[0].mxu0 }
 0x106   :  { %v153_v24 = vpop.f32.mrb[1].mxu0  ;;  %v1488_v25 = vpop.f32.mrb[0].mxu1 }
 0x107   :  { %v1648_v27 = vpack.c.bf16 %v1477_v23, %v153_v24  ;;  %v228_v28 = vpop.f32.mrb[1].mxu1 }
 0x108   :  { %v1652_v29 = vpack.c.bf16 %v1488_v25, %v228_v28 }
 0x109   :  { %1650 = vmatpush3.bf16.xpose.msk.msra.mxu0 %vm2053_vm3, %v1648_v27 }
 0x10a   :  { %1653 = vmatpush3.bf16.msra.mxu1 %v1652_v29  ;;  %1657 = vmatprep.subr.bf16.mxu0 %v1863_v19 }
 0x10b   :  { %1654 = vmatprep.subr.bf16.mxu1 %v1863_v19 }
 0x10d   :  { %v2061_v30 = vpop.f32.mrb[2].mxu0 }
 0x10e   :  { %v382_v31 = vpop.f32.mrb[2].mxu1  ;;  %v2063_v32 = vpop.f32.mrb[3].mxu0 }
 0x10f   :  { %v1510_v33 = vpop.f32.mrb[3].mxu1  ;;  %v1685_v34 = vpack.c.bf16 %v2061_v30, %v2063_v32 }
 0x110   :  { %1516 = vmatmul.mubr.msk.f32.vlgmr.msra.gmra.mrb[4].mxu0 %vm386_vm2, %v382_v31 }
 0x111   :  { %1540 = vmatprep.mubr.msk.f32.mxu0 %vm1864_vm1, %v1865_v21  ;;  %1659 = vmatpush3.bf16.msra.mxu0 %v1658_v51 }
 0x112   :  { %1660 = vmatprep.subr.bf16.mxu0 %v1863_v19 }
 0x115   :  { %1662 = vmatpush3.bf16.msra.mxu0 %v1661_v59 }
 0x116   :  { %1672 = vmatprep.subr.bf16.mxu0 %v1863_v19 }
 0x1e3   :  { %v462_v36 = vpop.f32.mrb[4].mxu0 }
 0x1e4   :  { %v466_v38 = vmul.f32 0.25, %v462_v36  ;;  %v1517_v39 = vpop.f32.mrb[5].mxu0 }
 0x1e5   :  { %v1149_v39 = vld [vmem:[#allocation3 + $0x8] sm:$0xff] }
 0x1e6   :  { %v470_v40 = vadd.f32 %v469_v37, %v466_v38  ;;  %v1148_v38 = vld [vmem:[#allocation3] sm:$0xff]  ;;  %vm1152_vm6 = vcmp.eq.f32.partialorder %v1149_v39, 0.0 }
 0x1e7   :  { %vm1151_vm5 = vcmp.eq.f32.partialorder %v1148_v38, 0.0 }
 0x1e8   :  { %v471_v41 = vsel %vm386_vm2, %v470_v40, -inf }
 0x1e9   :  { %472 = vmax.xlane.f32.xlu0 %v471_v41  ;;  %v1154_v41 = vsel %vm1151_vm5, -1e+30, %v1865_v21 }
 0x276   :  { %v473_v42 = vpop.xlane.xlu0 %472 }
 0x277   :  { %v474_v43 = vsub.f32 %v470_v40, %v473_v42  ;;  %v1150_v42 = vld [vmem:[#allocation3 + $0x10] sm:$0xff] }
 0x278   :  { %vm1153_vm7 = vcmp.eq.f32.partialorder %v1150_v42, 0.0 }
 0x279   :  { %v475_v44 = vmul.f32 1.442695, %v474_v43  ;;  %v1156_v50 = vsel %vm1153_vm7, -1e+30, %v1865_v21 }
 0x27b   :  { %1703 = vpow2.f32 %v475_v44  ;;  %v1155_v44 = vsel %vm1152_vm6, -1e+30, %v1865_v21 }
 0x285   :  { %v1704_v45 = vpop.eup %1703 }
 0x286   :  { %v477_v46 = vsel %vm386_vm2, %v1704_v45, 0.0 }
 0x287   :  { %478 = vadd.xlane.f32.xlu0 %v477_v46 }
 0x314   :  { %v479_v52 = vpop.xlane.xlu0 %478 }
 0x315   :  { %1705 = vrcp.f32 %v479_v52 }
 0x31f   :  { %v1706_v53 = vpop.eup %1705 }
 0x320   :  { %v481_v55 = vmul.f32 %v1706_v53, %v1704_v45 }
 0x322   :  { %1523 = vmatmul.mubr.msk.f32.vlgmr.msra.gmra.mrb[4].mxu1 %vm386_vm2, %v481_v55 }
 0x323   :  { %1656 = vmatpush3.bf16.msra.mxu1 %v1655_v54  ;;  %1529 = vmatprep.mubr.msk.f32.mxu1 %vm1864_vm1, %v1865_v21 }
 0x324   :  { %1663 = vmatprep.subr.bf16.mxu1 %v1863_v19 }
 0x326   :  { %1530 = vmatmul.mubr.msk.f32.vlgmr.msra.gmra.mrb[6].mxu1 %vm386_vm2, %v555_v47 }
 0x327   :  { %1665 = vmatpush3.bf16.msra.mxu1 %v1655_v54  ;;  %1547 = vmatprep.mubr.msk.f32.mxu1 %vm1864_vm1, %v1865_v21 }
 0x328   :  { %1666 = vmatprep.subr.bf16.mxu1 %v1863_v19 }
 0x32a   :  { %1548 = vmatmul.mubr.msk.f32.vlgmr.msra.gmra.mrb[8].mxu1 %vm386_vm2, %v712_v48 }
 0x32b   :  { %1558 = vmatprep.mubr.msk.f32.mxu1 %vm1864_vm1, %v1865_v21  ;;  %1668 = vmatpush3.bf16.msra.mxu1 %v1667_v61 }
 0x32c   :  { %1669 = vmatprep.subr.bf16.mxu1 %v1863_v19 }
 0x32f   :  { %1671 = vmatpush3.bf16.msra.mxu1 %v1670_v0 }
 0x330   :  { %1678 = vmatprep.subr.bf16.mxu1 %v1863_v19 }
 0x3f5   :  { %v551_v4 = vpop.f32.mrb[4].mxu1 }
 0x3f6   :  { %872 = vst.msk [vmem:[#allocation2] sm:$0xff] %vm80_vm0, %v551_v4  ;;  %869 = vst.msk [vmem:[#allocation10] sm:$0xff] %vm80_vm0, %v551_v4  ;;  %v1524_v5 = vpop.f32.mrb[5].mxu1 }
 0x3f9   :  { %v625_v6 = vpop.f32.mrb[6].mxu1 }
 0x3fa   :  { %v1531_v9 = vpop.f32.mrb[7].mxu1  ;;  %1541 = vmatmul.mubr.msk.f32.vlgmr.msra.gmra.mrb[6].mxu0 %vm80_vm0, %v625_v6 }
 0x3fb   :  { %1674 = vmatpush3.bf16.msra.mxu0 %v1975_v3  ;;  %1569 = vmatprep.mubr.msk.f32.mxu0 %vm1864_vm1, %v1865_v21  ;;  %v708_v3 = vpop.xlane.xlu1 %707 }
 0x3fc   :  { %1675 = vmatprep.subr.bf16.mxu0 %v1863_v19  ;;  %1707 = vrcp.f32 %v708_v3 }
 0x3fd   :  { %v782_v10 = vpop.f32.mrb[8].mxu1  ;;  %v878_v13 = vld [vmem:[#allocation2] sm:$0xff] }
 0x3fe   :  { %v1549_v11 = vpop.f32.mrb[9].mxu1  ;;  %1559 = vmatmul.mubr.msk.f32.vlgmr.msra.gmra.mrb[10].mxu1 %vm80_vm0, %v782_v10 }
 0x3ff   :  { %1677 = vmatpush3.bf16.msra.mxu0 %v1988_v8  ;;  %1680 = vmatpush3.bf16.msra.mxu1 %v1986_v7  ;;  %v865_v7 = vpop.xlane.xlu1 %864 }
 0x400   :  { %1681 = vmatprep.subr.bf16.mxu1 %v1863_v19  ;;  %1586 = vmatprep.mubr.msk.f32.mxu1 %vm1864_vm1, %v1865_v21  ;;  %1709 = vrcp.f32 %v865_v7 }
 0x401   :  { %1684 = vmatprep.subr.bf16.mxu0 %v1863_v19 }
 0x402   :  { %1570 = vmatmul.mubr.msk.f32.vlgmr.msra.gmra.mrb[8].mxu0 %vm80_vm0, %v878_v13 }
 0x403   :  { %1683 = vmatpush3.bf16.msra.mxu1 %v2002_v12  ;;  %1572 = vmatprep.mubr.msk.f32.mxu0 %vm1864_vm1, %v1865_v21 }
 0x406   :  { %1587 = vmatmul.mubr.msk.f32.vlgmr.msra.gmra.mrb[12].mxu1 %vm80_vm0, %v878_v13  ;;  %v1708_v8 = vpop.eup %1707 }
 0x407   :  { %1589 = vmatprep.mubr.msk.f32.mxu1 %vm1864_vm1, %v1865_v21 }
 0x408   :  { %1687 = vmatpush3.bf16.xpose.msk.msra.mxu0 %vm2053_vm3, %v1685_v34 }
 0x40a   :  { %v1710_v16 = vpop.eup %1709 }
 0x4cd   :  { %v702_v12 = vpop.f32.mrb[6].mxu0 }
 0x4ce   :  { %v711_v14 = vmul.f32 %v1708_v8, %v702_v12  ;;  %v1542_v15 = vpop.f32.mrb[7].mxu0 }
 0x4d0   :  { %873 = vst.msk [vmem:[#allocation2 + $0x8] sm:$0xff] %vm80_vm0, %v711_v14  ;;  %870 = vst.msk [vmem:[#allocation12] sm:$0xff] %vm80_vm0, %v711_v14 }
 0x4d1   :  { %v859_v17 = vpop.f32.mrb[10].mxu1 }
 0x4d2   :  { %v868_v18 = vmul.f32 %v1710_v16, %v859_v17  ;;  %v1560_v19 = vpop.f32.mrb[11].mxu1 }
 0x4d4   :  { %874 = vst.msk [vmem:[#allocation2 + $0x10] sm:$0xff] %vm80_vm0, %v868_v18  ;;  %871 = vst.msk [vmem:[#allocation13] sm:$0xff] %vm80_vm0, %v868_v18 }
 0x4d5   :  { %v956_v20 = vpop.f32.mrb[8].mxu0 }
 0x4d6   :  { %v1571_v22 = vpop.f32.mrb[9].mxu0 }
 0x4d7   :  { %v879_v23 = vld [vmem:[#allocation2 + $0x8] sm:$0xff] }
 0x4d8   :  { %1573 = vmatmul.mubr.msk.f32.gmra.mrb[10].mxu0 %vm80_vm0, %v879_v23  ;;  %1590 = vmatmul.mubr.msk.f32.gmra.mrb[14].mxu1 %vm80_vm0, %v879_v23 }
 0x4d9   :  { %v1036_v24 = vpop.f32.mrb[12].mxu1  ;;  %1575 = vmatprep.mubr.msk.f32.mxu0 %vm1864_vm1, %v1865_v21  ;;  %1592 = vmatprep.mubr.msk.f32.mxu1 %vm1864_vm1, %v1865_v21 }
 0x4da   :  { %v1588_v25 = vpop.f32.mrb[13].mxu1 }
 0x4db   :  { %v880_v26 = vld [vmem:[#allocation2 + $0x10] sm:$0xff] }
 0x4dc   :  { %1576 = vmatmul.mubr.msk.f32.gmra.mrb[12].mxu0 %vm80_vm0, %v880_v26  ;;  %1593 = vmatmul.mubr.msk.f32.gmra.mrb[16].mxu1 %vm80_vm0, %v880_v26 }
 0x4dd   :  { %1599 = vmatprep.mubr.msk.f32.mxu0 %vm1864_vm1, %v1865_v21 }
 0x4e0   :  { %1600 = vmatmul.mubr.msk.f32.vlgmr.msra.gmra.mrb[14].mxu0 %vm386_vm2, %v956_v20 }
 0x4e1   :  { %1602 = vmatprep.mubr.msk.f32.mxu0 %vm1864_vm1, %v1865_v21 }
 0x5ab   :  { %v961_v27 = vpop.f32.mrb[10].mxu0  ;;  %v1041_v28 = vpop.f32.mrb[14].mxu1 }
 0x5ac   :  { %v1688_v29 = vpack.c.bf16 %v1041_v28, %v1036_v24  ;;  %v1574_v30 = vpop.f32.mrb[11].mxu0  ;;  %v1591_v31 = vpop.f32.mrb[15].mxu1  ;;  %1603 = vmatmul.mubr.msk.f32.gmra.mrb[16].mxu0 %vm386_vm2, %v961_v27 }
 0x5ad   :  { %1605 = vmatprep.mubr.msk.f32.mxu0 %vm1864_vm1, %v1865_v21 }
 0x5ae   :  { %1689 = vmatprep.subr.bf16.mxu1 %v1688_v29 }
 0x5af   :  { %v966_v32 = vpop.f32.mrb[12].mxu0  ;;  %v1046_v33 = vpop.f32.mrb[16].mxu1  ;;  %1691 = vmatpush3.bf16.msra.mxu1 %v1688_v29 }
 0x5b0   :  { %v1577_v34 = vpop.f32.mrb[13].mxu0  ;;  %v1594_v35 = vpop.f32.mrb[17].mxu1  ;;  %1606 = vmatmul.mubr.msk.f32.gmra.mrb[18].mxu0 %vm386_vm2, %v966_v32  ;;  %1612 = vmatprep.subr.mxu1 %v1046_v33 }
 0x5b3   :  { %v1131_v36 = vpop.f32.mrb[14].mxu0  ;;  %1613 = vmatpush3.msra.mxu1 %v1046_v33 }
 0x5b4   :  { %v1601_v37 = vpop.f32.mrb[15].mxu0  ;;  %v1145_v40 = vmul.f32 0.25, %v1131_v36 }
 0x5b6   :  { %v1157_v45 = vadd.f32 %v1154_v41, %v1145_v40 }
 0x5b8   :  { %v1160_v51 = vsel %vm386_vm2, %v1157_v45, -inf }
 0x67f   :  { %v1136_v43 = vpop.f32.mrb[16].mxu0 }
 0x680   :  { %v1146_v46 = vmul.f32 0.25, %v1136_v43  ;;  %v1604_v47 = vpop.f32.mrb[17].mxu0 }
 0x682   :  { %v1158_v48 = vadd.f32 %v1155_v44, %v1146_v46 }
 0x683   :  { %v1141_v49 = vpop.f32.mrb[18].mxu0 }
 0x684   :  { %v1161_v52 = vsel %vm386_vm2, %v1158_v48, -inf  ;;  %v1147_v53 = vmul.f32 0.25, %v1141_v49  ;;  %v1607_v54 = vpop.f32.mrb[19].mxu0 }
 0x685   :  { %v1163_v55 = vmax.f32 %v1160_v51, %v1161_v52 }
 0x686   :  { %v1159_v56 = vadd.f32 %v1156_v50, %v1147_v53 }
 0x688   :  { %v1162_v57 = vsel %vm386_vm2, %v1159_v56, -inf }
 0x689   :  { %v1164_v58 = vmax.f32 %v1163_v55, %v1162_v57 }
 0x68b   :  { %v1165_v59 = vrot.slane %v1164_v58, 4 }
 0x68d   :  { %v1166_v60 = vmax.f32 %v1164_v58, %v1165_v59 }
 0x68f   :  { %v1167_v61 = vrot.slane %v1166_v60, 2 }
 0x691   :  { %v1168_v62 = vmax.f32 %v1166_v60, %v1167_v61 }
 0x693   :  { %v1169_v63 = vrot.slane %v1168_v62, 1 }
 0x695   :  { %v1170_v0 = vmax.f32 %v1168_v62, %v1169_v63 }
 0x697   :  { %v1172_v1 = vsub.f32 %v1158_v48, %v1170_v0  ;;  %v1173_v2 = vsub.f32 %v1159_v56, %v1170_v0  ;;  %v1171_v21 = vsub.f32 %v1157_v45, %v1170_v0 }
 0x699   :  { %v1176_v4 = vmul.f32 1.442695, %v1172_v1  ;;  %v1178_v5 = vmul.f32 1.442695, %v1173_v2  ;;  %v1174_v6 = vmul.f32 1.442695, %v1171_v21 }
 0x69b   :  { %1711 = vpow2.f32 %v1176_v4 }
 0x69c   :  { %1713 = vpow2.f32 %v1178_v5 }
 0x69d   :  { %1715 = vpow2.f32 %v1174_v6 }
 0x6a5   :  { %v1712_v9 = vpop.eup %1711 }
 0x6a6   :  { %v1714_v10 = vpop.eup %1713  ;;  %v1181_v11 = vsel %vm386_vm2, %v1712_v9, 0.0 }
 0x6a7   :  { %v1716_v13 = vpop.eup %1715  ;;  %v1183_v8 = vsel %vm386_vm2, %v1714_v10, 0.0 }
 0x6a8   :  { %v1180_v3 = vsel %vm386_vm2, %v1716_v13, 0.0 }
 0x6a9   :  { %v1182_v7 = vadd.f32 %v1181_v11, %v1180_v3 }
 0x6ab   :  { %v1184_v12 = vadd.f32 %v1183_v8, %v1182_v7 }
 0x6ad   :  { %v1185_v14 = vrot.slane %v1184_v12, 4 }
 0x6af   :  { %v1186_v15 = vadd.f32 %v1185_v14, %v1184_v12 }
 0x6b1   :  { %v1187_v16 = vrot.slane %v1186_v15, 2 }
 0x6b3   :  { %v1188_v17 = vadd.f32 %v1187_v16, %v1186_v15 }
 0x6b5   :  { %v1189_v18 = vrot.slane %v1188_v17, 1 }
 0x6b7   :  { %v1190_v19 = vadd.f32 %v1189_v18, %v1188_v17 }
 0x6b9   :  { %1717 = vrcp.f32 %v1190_v19 }
 0x6c3   :  { %v1718_v20 = vpop.eup %1717 }
 0x6c4   :  { %v1192_v22 = vmul.f32 %v1718_v20, %v1716_v13  ;;  %v1193_v23 = vmul.f32 %v1718_v20, %v1712_v9  ;;  %v1194_v24 = vmul.f32 %v1718_v20, %v1714_v10 }
 0x6c6   :  { %1195 = vxpose.xlu0.b32.start [1/3] (short) (narrow) %v1192_v22, 16 }
 0x6ca   :  { %1196 = vxpose.xlu0.b32.cont [2/3] (short) (narrow) %v1193_v23, 16 }
 0x6ce   :  { %1197 = vxpose.xlu0.b32.end [3/3] (short) (narrow) %v1194_v24, 16 }
 0x746   :  { %v1211_v25 = vpop.trf.xlu0 }
 0x747   :  { %1614 = vmatprep.mubr.msk.f32.mxu1 %vm1227_vm8, %v1211_v25 }
 0x74a   :  { %v1212_v26 = vpop.trf.xlu0 }
 0x74b   :  { %1615 = vmatmul.mubr.msk.f32.vlgmr.msra.gmra.mrb[18].mxu1 %vm1227_vm8, %v1212_v26 }
 0x74c   :  { %1774 = shalt.err (!%p1771_p6)
}
 0x74d   :  { %s1775_s20 = scalar_lea.hbm %s2242_s11, 128 }
 0x74e   :  { %p1776_p7 = scmp.ne.s32.totalorder %s2242_s11, %s1775_s20  ;;  %p1779_p8 = scmp.lt.u32.totalorder %s1775_s20, %s2242_s11 }
 0x750   :  { %p1781_p9 = pnand %p1779_p8, %p1776_p7 }
 0x752   :  { %1784 = shalt.err (!%p1781_p9)
}
 0x753   :  { %1332 = dma.vmem_to_hbm [thread:$0]  %s1330_s16, 128, %s2242_s11, [#allocation11]  }
 0x754   :  { %s1867_s22 = smov [#allocation12]   ;;  %s1868_s24 = smov [#allocation13]  }
 0x755   :  { %s1339_s23 = sshll.u32 %s1867_s22, 4  ;;  %s1349_s4 = sshll.u32 %s1868_s24, 4  ;;  %s1340_s23 = int_to_ptr.vmem [resolvable:$true] %s1339_s23  ;;  %s1350_s4 = int_to_ptr.vmem [resolvable:$true] %s1349_s4 }
 0x756   :  { %s1785_s25 = scalar_lea.vmem %s1340_s23, 128  ;;  %p1790_p11 = scmp.lt.s32.totalorder %s1340_s23, %s1340_s23 }
 0x757   :  { %p1786_p10 = scmp.ne.s32.totalorder %s1340_s23, %s1785_s25  ;;  %p1791_p12 = scmp.lt.s32.totalorder %s1785_s25, %s1785_s25 }
 0x759   :  { %p1792_p13 = por %p1791_p12, %p1790_p11 }
 0x75b   :  { %p1793_p0 = pnand %p1792_p13, %p1786_p10 }
 0x75d   :  { %1796 = shalt.err (!%p1793_p0)
}
 0x75e   :  { %s1797_s30 = scalar_lea.hbm %s2243_s12, 128 }
 0x75f   :  { %p1798_p1 = scmp.ne.s32.totalorder %s2243_s12, %s1797_s30  ;;  %p1801_p2 = scmp.lt.u32.totalorder %s1797_s30, %s2243_s12 }
 0x761   :  { %p1803_p3 = pnand %p1801_p2, %p1798_p1 }
 0x763   :  { %1806 = shalt.err (!%p1803_p3)
}
 0x764   :  { %1342 = dma.vmem_to_hbm [thread:$0]  %s1340_s23, 128, %s2243_s12, [#allocation11]  }
 0x765   :  { %s1807_s15 = scalar_lea.vmem %s1350_s4, 128  ;;  %p1812_p5 = scmp.lt.s32.totalorder %s1350_s4, %s1350_s4 }
 0x766   :  { %p1808_p4 = scmp.ne.s32.totalorder %s1350_s4, %s1807_s15  ;;  %p1813_p6 = scmp.lt.s32.totalorder %s1807_s15, %s1807_s15 }
 0x768   :  { %p1814_p7 = por %p1813_p6, %p1812_p5 }
 0x76a   :  { %p1815_p8 = pnand %p1814_p7, %p1808_p4 }
 0x76c   :  { %1818 = shalt.err (!%p1815_p8)
}
 0x76d   :  { %s1819_s16 = scalar_lea.hbm %s2244_s13, 128 }
 0x76e   :  { %p1820_p9 = scmp.ne.s32.totalorder %s2244_s13, %s1819_s16  ;;  %p1823_p10 = scmp.lt.u32.totalorder %s1819_s16, %s2244_s13 }
 0x770   :  { %p1825_p11 = pnand %p1823_p10, %p1820_p9 }
 0x772   :  { %1828 = shalt.err (!%p1825_p11)
}
 0x773   :  { %1352 = dma.vmem_to_hbm [thread:$0]  %s1350_s4, 128, %s2244_s13, [#allocation14]  }
 0x774   :  { %s1869_s0 = smov [#allocation9]  }
 0x775   :  { %s1316_s5 = sshll.u32 %s1869_s0, 4  ;;  %s1317_s5 = int_to_ptr.vmem [resolvable:$true] %s1316_s5 }
 0x776   :  { %s1829_s2 = scalar_lea.vmem %s1317_s5, 256  ;;  %p1834_p13 = scmp.lt.s32.totalorder %s1317_s5, %s1317_s5 }
 0x777   :  { %p1830_p12 = scmp.ne.s32.totalorder %s1317_s5, %s1829_s2  ;;  %p1835_p0 = scmp.lt.s32.totalorder %s1829_s2, %s1829_s2 }
 0x779   :  { %p1836_p1 = por %p1835_p0, %p1834_p13 }
 0x77b   :  { %p1837_p2 = pnand %p1836_p1, %p1830_p12 }
 0x81e   :  { %v1616_v27 = vpop.f32.mrb[18].mxu1 }
 0x81f   :  { %1310 = vst.msk [vmem:[#allocation9 + $0x8] sm:$0xff] %vm80_vm0, %v1616_v27  ;;  %v1300_v28 = vpop.f32.mrb[19].mxu1 }
 0x820   :  { %1309 = vst.msk [vmem:[#allocation9] sm:$0xff] %vm80_vm0, %v1300_v28 }
 0x821   :  { %1840 = shalt.err (!%p1837_p2)
}
 0x822   :  { %s1841_s13 = scalar_lea.hbm %s2241_s10, 256 }
 0x823   :  { %p1842_p3 = scmp.ne.s32.totalorder %s2241_s10, %s1841_s13  ;;  %p1845_p4 = scmp.lt.u32.totalorder %s1841_s13, %s2241_s10 }
 0x825   :  { %p1847_p5 = pnand %p1845_p4, %p1842_p3 }
 0x827   :  { %1850 = shalt.err (!%p1847_p5)
}
 0x828   :  { %s1870_s25 = smov 128   ;;  %s1871_s27 = smov 8  }
 0x829   :  { %1322 = dma.vmem_to_hbm [thread:$0]  %s1317_s5, 256, %s2241_s10, [#allocation6], %s1870_s25, %s1870_s25, %s1871_s27  }
 0x82a   :  { %1855 = dma.done.wait [#allocation6], 256  }
 0x82b   :  { %1856 = vsyncadd [#allocation6], 4294967040 }
 0x82c   :  { %1857 = dma.done.wait [#allocation11], 256  }
 0x82d   :  { %1858 = vsyncadd [#allocation11], 4294967040 }
 0x82e   :  { %1859 = dma.done.wait [#allocation14], 128  }
 0x82f   :  { %1860 = vsyncadd [#allocation14], 4294967168 }
 0x830   :  { %1365 = vsyncpa [#allocation5], 1 }
 0x831   :  { %1366 = vsyncpa [#allocation8], 1 }
 0x832   :  { %1367 = vsyncpa [#allocation6], 1 }
 0x833   :  { %1368 = vsyncpa [#allocation11], 1 }
 0x834   :  { %1369 = vsyncpa [#allocation14], 1 }

</bundles_post_ra>
